<compile_context>
chip_gen: v5e
topology: v5e:2x2
jax: 0.10.0
libtpu: 0.0.40
codegen_flags: <defaults>
</compile_context>

<pallas_src>
import math

import jax
import jax.numpy as jnp
from jax.experimental import pallas as pl
from jax.experimental.pallas import tpu as pltpu

MXU_DTYPE = jnp.bfloat16   # MXU operand dtype (accumulation stays f32)
BN_EPS = 1e-5


# ----------------------------------------------------------------------------
# Kernels
# ----------------------------------------------------------------------------
def _make_conv_kernel(tr, rt, h, apply_prologue):
    """3x3 conv as ONE fused-K banded matmul per row tile + BN partial stats.

    Optionally applies the previous stage's folded BN affine + ReLU to the
    input rows before the matmul (prologue fusion for conv2).
    """

    def compute(x_ref, w_ref, c_ref, stats_ref, scale_ref, shift_ref):
        r = pl.program_id(1)
        row0 = pl.multiple_of(r * tr, tr)

        def prep(v):                           # (k, W*Cin) -> f32 (+BN+ReLU)
            v = v.astype(jnp.float32)
            if apply_prologue:
                v = jnp.maximum(v * scale_ref[...] + shift_ref[...], 0.0)
            return v

        rows = prep(x_ref[0, pl.ds(row0, tr), :])            # (tr, W*Cin) f32
        zrow = jnp.zeros((1, rows.shape[1]), jnp.float32)

        if rt == 1:
            # Whole image in one tile: H-halo rows are the conv's zero pad.
            prev, nxt = zrow, zrow
        else:
            prev = prep(x_ref[0, pl.ds(jnp.maximum(row0 - 1, 0), 1), :])
            prev = jnp.where(r > 0, prev, zrow)
            nxt = prep(x_ref[0, pl.ds(jnp.minimum(row0 + tr, h - 1), 1), :])
            nxt = jnp.where(r < rt - 1, nxt, zrow)

        # Fused-K window: [row-1 | row | row+1] along lanes -> (tr, 3*W*Cin).
        top = jnp.concatenate([prev, rows[:tr - 1, :]], axis=0)
        bot = jnp.concatenate([rows[1:, :], nxt], axis=0)
        xp = jnp.concatenate([top, rows, bot], axis=1)

        # Single MXU matmul; column taps and W zero-padding live in the band.
        acc = jnp.dot(xp.astype(MXU_DTYPE), w_ref[...],
                      preferred_element_type=jnp.float32)     # (tr, W*Cout)
        c_ref[0] = acc.astype(c_ref.dtype)

        # Per-block partial BN statistics (finalized by a tiny jnp reduction
        # in the wrapper: sum over blocks and over the W replication).
        stats_ref[0, 0, 0:1, :] = jnp.sum(acc, axis=0, keepdims=True)
        stats_ref[0, 0, 1:2, :] = jnp.sum(acc * acc, axis=0, keepdims=True)

    if apply_prologue:
        def kernel(x_ref, w_ref, scale_ref, shift_ref, c_ref, stats_ref):
            compute(x_ref, w_ref, c_ref, stats_ref, scale_ref, shift_ref)
    else:
        def kernel(x_ref, w_ref, c_ref, stats_ref):
            compute(x_ref, w_ref, c_ref, stats_ref, None, None)
    return kernel


def _bn_relu_kernel(x_ref, scale_ref, shift_ref, o_ref):
    o_ref[...] = jnp.maximum(x_ref[...] * scale_ref[...] + shift_ref[...], 0.0)


# ----------------------------------------------------------------------------
# Tiling helpers
# ----------------------------------------------------------------------------
def _pick_row_tile(h, target=256):
    """Largest row tile: whole image if H <= target, else a big divisor."""
    if h <= target:
        return h
    for t in range(target, 7, -1):
        if h % t == 0 and t % 8 == 0:
            return t
    return h        # fall back to whole-image rows


def _row_block(m, wc, budget_bytes=8 << 20):
    """Largest divisor of m whose double-buffered in+out f32 tiles fit."""
    per_row = wc * 4 * 4
    if m * per_row <= budget_bytes:
        return m
    for bm in range(m, 0, -1):
        if m % bm == 0 and bm % 8 == 0 and bm * per_row <= budget_bytes:
            return bm
    return m


# ----------------------------------------------------------------------------
# pallas_call wrappers
# ----------------------------------------------------------------------------
def conv3x3_bn_stats(x2d, w_fused, scale_row=None, shift_row=None, *, out_dtype):
    """x2d: (N, H, W*Cin) lane-dense activations.

    Returns (conv output (N, H, W*Cout) in `out_dtype`,
             partial stats (N, RT, 2, W*Cout) f32 = per-block [sum, sum_sq]).
    """
    n, h, wcin = x2d.shape
    wcout = w_fused.shape[-1]
    apply_prologue = scale_row is not None
    tr = _pick_row_tile(h)
    rt = h // tr

    in_specs = [
        # Full image stays resident across the row-tile axis (no re-DMA).
        pl.BlockSpec((1, h, wcin), lambda i, r: (i, 0, 0)),
        pl.BlockSpec((3 * wcin, wcout), lambda i, r: (0, 0)),
    ]
    args = [x2d, w_fused]
    if apply_prologue:
        in_specs += [pl.BlockSpec((1, wcin), lambda i, r: (0, 0)),
                     pl.BlockSpec((1, wcin), lambda i, r: (0, 0))]
        args += [scale_row, shift_row]

    # NOTE: flops are the *executed* banded-matmul flops (W/3 x the true conv
    # flops), not a conv roofline number.
    flops = 2 * n * h * (3 * wcin) * wcout
    bytes_accessed = (int(x2d.size) * x2d.dtype.itemsize
                      + n * h * wcout * jnp.dtype(out_dtype).itemsize
                      + int(w_fused.size) * w_fused.dtype.itemsize)

    return pl.pallas_call(
        _make_conv_kernel(tr, rt, h, apply_prologue),
        out_shape=(jax.ShapeDtypeStruct((n, h, wcout), out_dtype),
                   jax.ShapeDtypeStruct((n, rt, 2, wcout), jnp.float32)),
        grid=(n, rt),
        in_specs=in_specs,
        out_specs=(pl.BlockSpec((1, tr, wcout), lambda i, r: (i, r, 0)),
                   pl.BlockSpec((1, 1, 2, wcout), lambda i, r: (i, r, 0, 0))),
        compiler_params=pltpu.CompilerParams(
            dimension_semantics=("parallel", "parallel"),
            vmem_limit_bytes=32 * 1024 * 1024),
        cost_estimate=pl.CostEstimate(flops=flops, transcendentals=0,
                                      bytes_accessed=bytes_accessed),
    )(*args)


def bn_relu(x2d, scale_row, shift_row):
    """Lane-dense BN affine + ReLU over (M, W*C) rows, large blocks."""
    m, wc = x2d.shape
    bm = _row_block(m, wc)
    return pl.pallas_call(
        _bn_relu_kernel,
        out_shape=jax.ShapeDtypeStruct((m, wc), jnp.float32),
        grid=(m // bm,),
        in_specs=[pl.BlockSpec((bm, wc), lambda i: (i, 0)),
                  pl.BlockSpec((1, wc), lambda i: (0, 0)),
                  pl.BlockSpec((1, wc), lambda i: (0, 0))],
        out_specs=pl.BlockSpec((bm, wc), lambda i: (i, 0)),
        compiler_params=pltpu.CompilerParams(
            dimension_semantics=("parallel",),
            vmem_limit_bytes=32 * 1024 * 1024),
    )(x2d, scale_row, shift_row)


# ----------------------------------------------------------------------------
# Parameter / statistics plumbing (tiny, one-time jnp ops)
# ----------------------------------------------------------------------------
def make_banded_weights(w_oihw, w_img, cin_pad=None):
    """PyTorch (Cout, Cin, 3, 3) weight -> fused (3*W*Cin, W*Cout) band:
    rows [dh*W*Cin + wi*Cin + ci] hold w[dh, wi-wo+1, ci, co] inside the
    3-tap band, zero outside (== zero padding along W)."""
    cout, cin, _, _ = w_oihw.shape
    if cin_pad is not None and cin_pad > cin:
        w_oihw = jnp.pad(w_oihw, ((0, 0), (0, cin_pad - cin), (0, 0), (0, 0)))
        cin = cin_pad
    w = jnp.transpose(w_oihw, (2, 3, 1, 0))              # (3, 3, Cin, Cout)
    wi = jnp.arange(w_img)[:, None]
    wo = jnp.arange(w_img)[None, :]
    dw = wi - wo + 1                                     # (W, W)
    valid = (dw >= 0) & (dw < 3)
    band = w[:, jnp.clip(dw, 0, 2)]                      # (3, W, W, Cin, Cout)
    band = band * valid[None, :, :, None, None]
    band = jnp.transpose(band, (0, 1, 3, 2, 4))          # (3, W, Cin, W, Cout)
    return band.reshape(3 * w_img * cin, w_img * cout)


def fold_stats(stats, gamma, beta, w_img, c, count, eps=BN_EPS):
    """Finalize in-kernel partial sums into BN scale/shift (f32, tiny)."""
    st = jnp.sum(stats, axis=(0, 1))                     # (2, W*C)
    st = jnp.sum(st.reshape(2, w_img, c), axis=1)        # (2, C)
    mean = st[0] / count
    var = jnp.maximum(st[1] / count - mean * mean, 0.0)  # biased (training) var
    scale = gamma * jax.lax.rsqrt(var + eps)
    shift = beta - mean * scale
    return scale, shift


def init_params(key, in_c, out_c):
    ks = jax.random.split(key, 8)
    w = lambda k, s: 0.1 * jax.random.normal(k, s, jnp.float32)
    return dict(
        conv1_w=w(ks[0], (out_c, in_c, 3, 3)),   # PyTorch OIHW
        conv1_b=w(ks[1], (out_c,)),
        bn1_g=1.0 + 0.1 * jax.random.normal(ks[2], (out_c,), jnp.float32),
        bn1_b=w(ks[3], (out_c,)),
        conv2_w=w(ks[4], (out_c, out_c, 3, 3)),
        conv2_b=w(ks[5], (out_c,)),
        bn2_g=1.0 + 0.1 * jax.random.normal(ks[6], (out_c,), jnp.float32),
        bn2_b=w(ks[7], (out_c,)),
    )


# ----------------------------------------------------------------------------
# Forward pass
# ----------------------------------------------------------------------------
def conv_block(params, x_nchw):
    n, cin, h, w = x_nchw.shape
    cout = params["conv1_w"].shape[0]
    count = n * h * w

    # Pad Cin so W*Cin is a multiple of 128 (lane-dense conv1 input / K).
    mult = 128 // math.gcd(w, 128)
    cin_p = ((cin + mult - 1) // mult) * mult

    # NCHW -> NHWC -> (N, H, W*Cin_p); the final reshape is free (contiguous).
    x = jnp.transpose(x_nchw, (0, 2, 3, 1))
    if cin_p > cin:
        x = jnp.pad(x, ((0, 0), (0, 0), (0, 0), (0, cin_p - cin)))
    x = x.reshape(n, h, w * cin_p)

    # Conv biases are omitted on purpose: training-mode BN right after each
    # conv cancels them exactly (mean shift only, variance unchanged).
    w1 = make_banded_weights(params["conv1_w"], w, cin_pad=cin_p).astype(MXU_DTYPE)

    # Stage 1: conv1 (+ fused BN1 partial statistics); intermediate in bf16.
    c1, st1 = conv3x3_bn_stats(x, w1, out_dtype=MXU_DTYPE)
    scale1, shift1 = fold_stats(st1, params["bn1_g"], params["bn1_b"],
                                w, cout, count)

    # Stage 2: conv2 with BN1 affine + ReLU fused into its prologue
    # (+ fused BN2 partial statistics).
    w2 = make_banded_weights(params["conv2_w"], w).astype(MXU_DTYPE)
    c2, st2 = conv3x3_bn_stats(
        c1, w2,
        jnp.tile(scale1, w).reshape(1, w * cout),
        jnp.tile(shift1, w).reshape(1, w * cout),
        out_dtype=jnp.float32)
    scale2, shift2 = fold_stats(st2, params["bn2_g"], params["bn2_b"],
                                w, cout, count)

    # Stage 3: lane-dense BN2 + ReLU (large blocks), then NCHW writeback.
    y = bn_relu(c2.reshape(n * h, w * cout),
                jnp.tile(scale2, w).reshape(1, w * cout),
                jnp.tile(shift2, w).reshape(1, w * cout))
    return jnp.transpose(y.reshape(n, h, w, cout), (0, 3, 1, 2))   # -> NCHW


# ----------------------------------------------------------------------------
# Pure-JAX reference (numerical check)
# ----------------------------------------------------------------------------
def reference(params, x_nchw, eps=BN_EPS):
    x = jnp.transpose(x_nchw, (0, 2, 3, 1))

    def conv(xx, w_oihw, b):
        wk = jnp.transpose(w_oihw, (2, 3, 1, 0))
        return jax.lax.conv_general_dilated(
            xx, wk, (1, 1), ((1, 1), (1, 1)),
            dimension_numbers=("NHWC", "HWIO", "NHWC")) + b

    def bn_relu_ref(c, g, b):
        m = jnp.mean(c, axis=(0, 1, 2))
        v = jnp.var(c, axis=(0, 1, 2))
        return jnp.maximum((c - m) * g * jax.lax.rsqrt(v + eps) + b, 0.0)

    a1 = bn_relu_ref(conv(x, params["conv1_w"], params["conv1_b"]),
                     params["bn1_g"], params["bn1_b"])
    a2 = bn_relu_ref(conv(a1, params["conv2_w"], params["conv2_b"]),
                     params["bn2_g"], params["bn2_b"])
    return jnp.transpose(a2, (0, 3, 1, 2))


# ----------------------------------------------------------------------------
if __name__ == "__main__":
    key = jax.random.PRNGKey(0)
    k_x, k_p = jax.random.split(key)

    N, in_c, out_c, H, W = 2, 4, 8, 16, 16            # W*out_c = 128 (lane-dense)
    x = jax.random.normal(k_x, (N, in_c, H, W), jnp.float32)   # NCHW
    params = init_params(k_p, in_c, out_c)

    out = jax.jit(conv_block)(params, x)
    out = jax.block_until_ready(out)

    assert out.shape == (N, out_c, H, W), out.shape
    ref = reference(params, x)
    # Tolerance accounts for bf16 MXU operands and the bf16 conv1 intermediate
    # (f32 accumulation and f32 BN statistics throughout).
    assert jnp.allclose(out, ref, atol=5e-2, rtol=5e-2), float(
        jnp.max(jnp.abs(out - ref)))

    print("KERNEL_OK")
</pallas_src>

<mosaic_0001>
module attributes {stable_mosaic.version = 11 : i64} {
  func.func @kernel(%arg0: i32, %arg1: i32, %arg2: memref<1x16x128xf32, #tpu.memory_space<vmem>>, %arg3: memref<384x128xbf16, #tpu.memory_space<vmem>>, %arg4: memref<1x16x128xbf16, #tpu.memory_space<vmem>>, %arg5: memref<1x1x2x128xf32, #tpu.memory_space<vmem>>) attributes {dimension_semantics = [#tpu.dimension_semantics<parallel>, #tpu.dimension_semantics<parallel>], iteration_bounds = array<i64: 2, 1>, scalar_prefetch = 0 : i64, scratch_operands = 0 : i64, tpu.core_type = #tpu.core_type<tc>, window_params = [{transform_indices = @transform_0, window_bounds = array<i64: 1, 16, 128>}, {pipeline_mode = #tpu.pipeline_mode<synchronous>, transform_indices = @transform_1, window_bounds = array<i64: 384, 128>}, {transform_indices = @transform_2, window_bounds = array<i64: 1, 16, 128>}, {transform_indices = @transform_3, window_bounds = array<i64: 1, 1, 2, 128>}]} {
    %c16_i32 = arith.constant 16 : i32
    %0 = arith.muli %arg1, %c16_i32 : i32
    %1 = tpu.assume_multiple %0, 16 : i32
    %c0 = arith.constant 0 : index
    %2 = arith.index_cast %1 : i32 to index
    %c0_0 = arith.constant 0 : index
    %3 = vector.load %arg2[%c0, %2, %c0_0] : memref<1x16x128xf32, #tpu.memory_space<vmem>>, vector<1x16x128xf32>
    %4 = vector.shape_cast %3 : vector<1x16x128xf32> to vector<16x128xf32>
    %cst = arith.constant 0.000000e+00 : f32
    %5 = vector.broadcast %cst : f32 to vector<1x128xf32>
    %6 = vector.extract_strided_slice %4 {offsets = [0, 0], sizes = [15, 128], strides = [1, 1]} : vector<16x128xf32> to vector<15x128xf32>
    %7 = tpu.concatenate %5, %6 in 0 : vector<1x128xf32>, vector<15x128xf32> -> vector<16x128xf32>
    %8 = vector.extract_strided_slice %4 {offsets = [1, 0], sizes = [15, 128], strides = [1, 1]} : vector<16x128xf32> to vector<15x128xf32>
    %9 = tpu.concatenate %8, %5 in 0 : vector<15x128xf32>, vector<1x128xf32> -> vector<16x128xf32>
    %10 = tpu.concatenate %7, %4, %9 in 1 : vector<16x128xf32>, vector<16x128xf32>, vector<16x128xf32> -> vector<16x384xf32>
    %11 = arith.truncf %10 : vector<16x384xf32> to vector<16x384xbf16>
    %c0_1 = arith.constant 0 : index
    %c0_2 = arith.constant 0 : index
    %12 = vector.load %arg3[%c0_1, %c0_2] : memref<384x128xbf16, #tpu.memory_space<vmem>>, vector<384x128xbf16>
    %cst_3 = arith.constant dense<0.000000e+00> : vector<16x128xf32>
    %13 = tpu.matmul %11, %12, %cst_3 {dimension_numbers = #tpu.dot_dimension_numbers<[1], [0], [0], [1], [0, 0, 1, 1], [], []>} : vector<16x384xbf16>, vector<384x128xbf16>, vector<16x128xf32> -> vector<16x128xf32>
    %14 = arith.truncf %13 : vector<16x128xf32> to vector<16x128xbf16>
    %c0_4 = arith.constant 0 : index
    %c0_5 = arith.constant 0 : index
    %c0_6 = arith.constant 0 : index
    %15 = vector.load %arg4[%c0_4, %c0_5, %c0_6] : memref<1x16x128xbf16, #tpu.memory_space<vmem>>, vector<1x16x128xbf16>
    %16 = vector.shape_cast %15 : vector<1x16x128xbf16> to vector<16x128xbf16>
    %17 = vector.shape_cast %14 : vector<16x128xbf16> to vector<1x16x128xbf16>
    tpu.vector_store %arg4[%c0_4, %c0_5, %c0_6], %17 {strides = array<i32>} : memref<1x16x128xbf16, #tpu.memory_space<vmem>>, vector<1x16x128xbf16>,
    %cst_7 = arith.constant dense<0.000000e+00> : vector<128xf32>
    %18 = vector.multi_reduction <add>, %13, %cst_7 [0] : vector<16x128xf32> to vector<128xf32>
    %19 = vector.shape_cast %18 : vector<128xf32> to vector<1x128xf32>
    %c0_8 = arith.constant 0 : index
    %c0_9 = arith.constant 0 : index
    %c0_10 = arith.constant 0 : index
    %c0_11 = arith.constant 0 : index
    %20 = vector.load %arg5[%c0_8, %c0_9, %c0_10, %c0_11] : memref<1x1x2x128xf32, #tpu.memory_space<vmem>>, vector<1x1x1x128xf32>
    %21 = vector.shape_cast %20 : vector<1x1x1x128xf32> to vector<1x128xf32>
    %22 = vector.shape_cast %19 : vector<1x128xf32> to vector<1x1x1x128xf32>
    tpu.vector_store %arg5[%c0_8, %c0_9, %c0_10, %c0_11], %22 {strides = array<i32>} : memref<1x1x2x128xf32, #tpu.memory_space<vmem>>, vector<1x1x1x128xf32>,
    %23 = arith.mulf %13, %13 : vector<16x128xf32>
    %cst_12 = arith.constant dense<0.000000e+00> : vector<128xf32>
    %24 = vector.multi_reduction <add>, %23, %cst_12 [0] : vector<16x128xf32> to vector<128xf32>
    %25 = vector.shape_cast %24 : vector<128xf32> to vector<1x128xf32>
    %c0_13 = arith.constant 0 : index
    %c0_14 = arith.constant 0 : index
    %c1 = arith.constant 1 : index
    %c0_15 = arith.constant 0 : index
    %26 = vector.load %arg5[%c0_13, %c0_14, %c1, %c0_15] : memref<1x1x2x128xf32, #tpu.memory_space<vmem>>, vector<1x1x1x128xf32>
    %27 = vector.shape_cast %26 : vector<1x1x1x128xf32> to vector<1x128xf32>
    %28 = vector.shape_cast %25 : vector<1x128xf32> to vector<1x1x1x128xf32>
    tpu.vector_store %arg5[%c0_13, %c0_14, %c1, %c0_15], %28 {strides = array<i32>} : memref<1x1x2x128xf32, #tpu.memory_space<vmem>>, vector<1x1x1x128xf32>,
    return
  }
  func.func @transform_0(%arg0: i32, %arg1: i32) -> (i32, i32, i32) {
    %c0_i32 = arith.constant 0 : i32
    %c0_i32_0 = arith.constant 0 : i32
    %c0_i32_1 = arith.constant 0 : i32
    return %arg0, %c0_i32, %c0_i32_0 : i32, i32, i32
  }
  func.func @transform_1(%arg0: i32, %arg1: i32) -> (i32, i32) {
    %c0_i32 = arith.constant 0 : i32
    %c0_i32_0 = arith.constant 0 : i32
    %c0_i32_1 = arith.constant 0 : i32
    return %c0_i32, %c0_i32_0 : i32, i32
  }
  func.func @transform_2(%arg0: i32, %arg1: i32) -> (i32, i32, i32) {
    %c0_i32 = arith.constant 0 : i32
    %c0_i32_0 = arith.constant 0 : i32
    return %arg0, %arg1, %c0_i32 : i32, i32, i32
  }
  func.func @transform_3(%arg0: i32, %arg1: i32) -> (i32, i32, i32, i32) {
    %c0_i32 = arith.constant 0 : i32
    %c0_i32_0 = arith.constant 0 : i32
    %c0_i32_1 = arith.constant 0 : i32
    return %arg0, %arg1, %c0_i32, %c0_i32_0 : i32, i32, i32, i32
  }
}

module attributes {stable_mosaic.version = 11 : i64} {
  func.func @kernel(%arg0: i32, %arg1: i32, %arg2: memref<1x16x128xbf16, #tpu.memory_space<vmem>>, %arg3: memref<384x128xbf16, #tpu.memory_space<vmem>>, %arg4: memref<1x128xf32, #tpu.memory_space<vmem>>, %arg5: memref<1x128xf32, #tpu.memory_space<vmem>>, %arg6: memref<1x16x128xf32, #tpu.memory_space<vmem>>, %arg7: memref<1x1x2x128xf32, #tpu.memory_space<vmem>>) attributes {dimension_semantics = [#tpu.dimension_semantics<parallel>, #tpu.dimension_semantics<parallel>], iteration_bounds = array<i64: 2, 1>, scalar_prefetch = 0 : i64, scratch_operands = 0 : i64, tpu.core_type = #tpu.core_type<tc>, window_params = [{transform_indices = @transform_0, window_bounds = array<i64: 1, 16, 128>}, {pipeline_mode = #tpu.pipeline_mode<synchronous>, transform_indices = @transform_1, window_bounds = array<i64: 384, 128>}, {pipeline_mode = #tpu.pipeline_mode<synchronous>, transform_indices = @transform_2, window_bounds = array<i64: 1, 128>}, {pipeline_mode = #tpu.pipeline_mode<synchronous>, transform_indices = @transform_3, window_bounds = array<i64: 1, 128>}, {transform_indices = @transform_4, window_bounds = array<i64: 1, 16, 128>}, {transform_indices = @transform_5, window_bounds = array<i64: 1, 1, 2, 128>}]} {
    %c16_i32 = arith.constant 16 : i32
    %0 = arith.muli %arg1, %c16_i32 : i32
    %1 = tpu.assume_multiple %0, 16 : i32
    %c0 = arith.constant 0 : index
    %2 = arith.index_cast %1 : i32 to index
    %c0_0 = arith.constant 0 : index
    %3 = vector.load %arg2[%c0, %2, %c0_0] : memref<1x16x128xbf16, #tpu.memory_space<vmem>>, vector<1x16x128xbf16>
    %4 = vector.shape_cast %3 : vector<1x16x128xbf16> to vector<16x128xbf16>
    %5 = arith.extf %4 : vector<16x128xbf16> to vector<16x128xf32>
    %c0_1 = arith.constant 0 : index
    %c0_2 = arith.constant 0 : index
    %6 = vector.load %arg4[%c0_1, %c0_2] : memref<1x128xf32, #tpu.memory_space<vmem>>, vector<1x128xf32>
    %7 = vector.broadcast %6 : vector<1x128xf32> to vector<16x128xf32>
    %8 = arith.mulf %5, %7 : vector<16x128xf32>
    %c0_3 = arith.constant 0 : index
    %c0_4 = arith.constant 0 : index
    %9 = vector.load %arg5[%c0_3, %c0_4] : memref<1x128xf32, #tpu.memory_space<vmem>>, vector<1x128xf32>
    %10 = vector.broadcast %9 : vector<1x128xf32> to vector<16x128xf32>
    %11 = arith.addf %8, %10 : vector<16x128xf32>
    %cst = arith.constant 0.000000e+00 : f32
    %12 = vector.broadcast %cst : f32 to vector<16x128xf32>
    %13 = arith.maximumf %11, %12 : vector<16x128xf32>
    %cst_5 = arith.constant 0.000000e+00 : f32
    %14 = vector.broadcast %cst_5 : f32 to vector<1x128xf32>
    %15 = vector.extract_strided_slice %13 {offsets = [0, 0], sizes = [15, 128], strides = [1, 1]} : vector<16x128xf32> to vector<15x128xf32>
    %16 = tpu.concatenate %14, %15 in 0 : vector<1x128xf32>, vector<15x128xf32> -> vector<16x128xf32>
    %17 = vector.extract_strided_slice %13 {offsets = [1, 0], sizes = [15, 128], strides = [1, 1]} : vector<16x128xf32> to vector<15x128xf32>
    %18 = tpu.concatenate %17, %14 in 0 : vector<15x128xf32>, vector<1x128xf32> -> vector<16x128xf32>
    %19 = tpu.concatenate %16, %13, %18 in 1 : vector<16x128xf32>, vector<16x128xf32>, vector<16x128xf32> -> vector<16x384xf32>
    %20 = arith.truncf %19 : vector<16x384xf32> to vector<16x384xbf16>
    %c0_6 = arith.constant 0 : index
    %c0_7 = arith.constant 0 : index
    %21 = vector.load %arg3[%c0_6, %c0_7] : memref<384x128xbf16, #tpu.memory_space<vmem>>, vector<384x128xbf16>
    %cst_8 = arith.constant dense<0.000000e+00> : vector<16x128xf32>
    %22 = tpu.matmul %20, %21, %cst_8 {dimension_numbers = #tpu.dot_dimension_numbers<[1], [0], [0], [1], [0, 0, 1, 1], [], []>} : vector<16x384xbf16>, vector<384x128xbf16>, vector<16x128xf32> -> vector<16x128xf32>
    %c0_9 = arith.constant 0 : index
    %c0_10 = arith.constant 0 : index
    %c0_11 = arith.constant 0 : index
    %23 = vector.load %arg6[%c0_9, %c0_10, %c0_11] : memref<1x16x128xf32, #tpu.memory_space<vmem>>, vector<1x16x128xf32>
    %24 = vector.shape_cast %23 : vector<1x16x128xf32> to vector<16x128xf32>
    %25 = vector.shape_cast %22 : vector<16x128xf32> to vector<1x16x128xf32>
    tpu.vector_store %arg6[%c0_9, %c0_10, %c0_11], %25 {strides = array<i32>} : memref<1x16x128xf32, #tpu.memory_space<vmem>>, vector<1x16x128xf32>,
    %cst_12 = arith.constant dense<0.000000e+00> : vector<128xf32>
    %26 = vector.multi_reduction <add>, %22, %cst_12 [0] : vector<16x128xf32> to vector<128xf32>
    %27 = vector.shape_cast %26 : vector<128xf32> to vector<1x128xf32>
    %c0_13 = arith.constant 0 : index
    %c0_14 = arith.constant 0 : index
    %c0_15 = arith.constant 0 : index
    %c0_16 = arith.constant 0 : index
    %28 = vector.load %arg7[%c0_13, %c0_14, %c0_15, %c0_16] : memref<1x1x2x128xf32, #tpu.memory_space<vmem>>, vector<1x1x1x128xf32>
    %29 = vector.shape_cast %28 : vector<1x1x1x128xf32> to vector<1x128xf32>
    %30 = vector.shape_cast %27 : vector<1x128xf32> to vector<1x1x1x128xf32>
    tpu.vector_store %arg7[%c0_13, %c0_14, %c0_15, %c0_16], %30 {strides = array<i32>} : memref<1x1x2x128xf32, #tpu.memory_space<vmem>>, vector<1x1x1x128xf32>,
    %31 = arith.mulf %22, %22 : vector<16x128xf32>
    %cst_17 = arith.constant dense<0.000000e+00> : vector<128xf32>
    %32 = vector.multi_reduction <add>, %31, %cst_17 [0] : vector<16x128xf32> to vector<128xf32>
    %33 = vector.shape_cast %32 : vector<128xf32> to vector<1x128xf32>
    %c0_18 = arith.constant 0 : index
    %c0_19 = arith.constant 0 : index
    %c1 = arith.constant 1 : index
    %c0_20 = arith.constant 0 : index
    %34 = vector.load %arg7[%c0_18, %c0_19, %c1, %c0_20] : memref<1x1x2x128xf32, #tpu.memory_space<vmem>>, vector<1x1x1x128xf32>
    %35 = vector.shape_cast %34 : vector<1x1x1x128xf32> to vector<1x128xf32>
    %36 = vector.shape_cast %33 : vector<1x128xf32> to vector<1x1x1x128xf32>
    tpu.vector_store %arg7[%c0_18, %c0_19, %c1, %c0_20], %36 {strides = array<i32>} : memref<1x1x2x128xf32, #tpu.memory_space<vmem>>, vector<1x1x1x128xf32>,
    return
  }
  func.func @transform_0(%arg0: i32, %arg1: i32) -> (i32, i32, i32) {
    %c0_i32 = arith.constant 0 : i32
    %c0_i32_0 = arith.constant 0 : i32
    %c0_i32_1 = arith.constant 0 : i32
    return %arg0, %c0_i32, %c0_i32_0 : i32, i32, i32
  }
  func.func @transform_1(%arg0: i32, %arg1: i32) -> (i32, i32) {
    %c0_i32 = arith.constant 0 : i32
    %c0_i32_0 = arith.constant 0 : i32
    %c0_i32_1 = arith.constant 0 : i32
    return %c0_i32, %c0_i32_0 : i32, i32
  }
  func.func @transform_2(%arg0: i32, %arg1: i32) -> (i32, i32) {
    %c0_i32 = arith.constant 0 : i32
    %c0_i32_0 = arith.constant 0 : i32
    %c0_i32_1 = arith.constant 0 : i32
    return %c0_i32, %c0_i32_0 : i32, i32
  }
  func.func @transform_3(%arg0: i32, %arg1: i32) -> (i32, i32) {
    %c0_i32 = arith.constant 0 : i32
    %c0_i32_0 = arith.constant 0 : i32
    %c0_i32_1 = arith.constant 0 : i32
    return %c0_i32, %c0_i32_0 : i32, i32
  }
  func.func @transform_4(%arg0: i32, %arg1: i32) -> (i32, i32, i32) {
    %c0_i32 = arith.constant 0 : i32
    %c0_i32_0 = arith.constant 0 : i32
    return %arg0, %arg1, %c0_i32 : i32, i32, i32
  }
  func.func @transform_5(%arg0: i32, %arg1: i32) -> (i32, i32, i32, i32) {
    %c0_i32 = arith.constant 0 : i32
    %c0_i32_0 = arith.constant 0 : i32
    %c0_i32_1 = arith.constant 0 : i32
    return %arg0, %arg1, %c0_i32, %c0_i32_0 : i32, i32, i32, i32
  }
}

module attributes {stable_mosaic.version = 11 : i64} {
  func.func @_bn_relu_kernel(%arg0: i32, %arg1: memref<32x128xf32, #tpu.memory_space<vmem>>, %arg2: memref<1x128xf32, #tpu.memory_space<vmem>>, %arg3: memref<1x128xf32, #tpu.memory_space<vmem>>, %arg4: memref<32x128xf32, #tpu.memory_space<vmem>>) attributes {dimension_semantics = [#tpu.dimension_semantics<parallel>], iteration_bounds = array<i64: 1>, scalar_prefetch = 0 : i64, scratch_operands = 0 : i64, tpu.core_type = #tpu.core_type<tc>, window_params = [{transform_indices = @transform_0, window_bounds = array<i64: 32, 128>}, {pipeline_mode = #tpu.pipeline_mode<synchronous>, transform_indices = @transform_1, window_bounds = array<i64: 1, 128>}, {pipeline_mode = #tpu.pipeline_mode<synchronous>, transform_indices = @transform_2, window_bounds = array<i64: 1, 128>}, {transform_indices = @transform_3, window_bounds = array<i64: 32, 128>}]} {
    %c0 = arith.constant 0 : index
    %c0_0 = arith.constant 0 : index
    %0 = vector.load %arg1[%c0, %c0_0] : memref<32x128xf32, #tpu.memory_space<vmem>>, vector<32x128xf32>
    %c0_1 = arith.constant 0 : index
    %c0_2 = arith.constant 0 : index
    %1 = vector.load %arg2[%c0_1, %c0_2] : memref<1x128xf32, #tpu.memory_space<vmem>>, vector<1x128xf32>
    %2 = vector.broadcast %1 : vector<1x128xf32> to vector<32x128xf32>
    %3 = arith.mulf %0, %2 : vector<32x128xf32>
    %c0_3 = arith.constant 0 : index
    %c0_4 = arith.constant 0 : index
    %4 = vector.load %arg3[%c0_3, %c0_4] : memref<1x128xf32, #tpu.memory_space<vmem>>, vector<1x128xf32>
    %5 = vector.broadcast %4 : vector<1x128xf32> to vector<32x128xf32>
    %6 = arith.addf %3, %5 : vector<32x128xf32>
    %cst = arith.constant 0.000000e+00 : f32
    %7 = vector.broadcast %cst : f32 to vector<32x128xf32>
    %8 = arith.maximumf %6, %7 : vector<32x128xf32>
    %c0_5 = arith.constant 0 : index
    %c0_6 = arith.constant 0 : index
    %9 = vector.load %arg4[%c0_5, %c0_6] : memref<32x128xf32, #tpu.memory_space<vmem>>, vector<32x128xf32>
    tpu.vector_store %arg4[%c0_5, %c0_6], %8 {strides = array<i32>} : memref<32x128xf32, #tpu.memory_space<vmem>>, vector<32x128xf32>,
    return
  }
  func.func @transform_0(%arg0: i32) -> (i32, i32) {
    %c0_i32 = arith.constant 0 : i32
    %c0_i32_0 = arith.constant 0 : i32
    return %arg0, %c0_i32 : i32, i32
  }
  func.func @transform_1(%arg0: i32) -> (i32, i32) {
    %c0_i32 = arith.constant 0 : i32
    %c0_i32_0 = arith.constant 0 : i32
    %c0_i32_1 = arith.constant 0 : i32
    return %c0_i32, %c0_i32_0 : i32, i32
  }
  func.func @transform_2(%arg0: i32) -> (i32, i32) {
    %c0_i32 = arith.constant 0 : i32
    %c0_i32_0 = arith.constant 0 : i32
    %c0_i32_1 = arith.constant 0 : i32
    return %c0_i32, %c0_i32_0 : i32, i32
  }
  func.func @transform_3(%arg0: i32) -> (i32, i32) {
    %c0_i32 = arith.constant 0 : i32
    %c0_i32_0 = arith.constant 0 : i32
    return %arg0, %c0_i32 : i32, i32
  }
}

</mosaic_0001>

<bundles_post_ra>
// kernel: tile.23
= control target key start
LH: loop header
LB: loop body
LE: loop exit
PB: predicated region body
PF: predicated region fallthrough
CT: control target
= control target key end

     0   :  { %s28_s0 = inlined_call_operand.vmem [shape: f32[8], index: 0, kind: input, shape index: {}]   ;;  %s29_s1 = inlined_call_operand.vmem [shape: f32[16,8], index: 1, kind: output, shape index: {}]  }
   0x1   :  { %v4_v0 = vld [vmem:[%s28_s0] ss:$0 sm:$0xff] }
   0x2   :  { %5 = vst [vmem:[%s29_s1] sm:$0xff] %v4_v0 }
   0x3   :  { %8 = vst [vmem:[%s29_s1 + $0x8] sm:$0xff] %v4_v0 }

// kernel: tile.24
= control target key start
LH: loop header
LB: loop body
LE: loop exit
PB: predicated region body
PF: predicated region fallthrough
CT: control target
= control target key end

     0   :  { %s131_s10 = smov 120   ;;  %s132_s11 = smov 104   ;;  %vm3_vm0 = vcmask 64512   ;;  %vm9_vm1 = vcmask 1048512   ;;  %vm15_vm2 = vcmask 982912   ;;  %vm21_vm3 = vcmask 917312   ;;  %s207_s0 = inlined_call_operand.vmem [shape: f32[16,8], index: 0, kind: input, shape index: {}]   ;;  %s208_s1 = inlined_call_operand.vmem [shape: f32[1,128], index: 1, kind: output, shape index: {}]  }
   0x1   :  { %v101_v0 = vld [vmem:[%s207_s0 + $0xf] sm:$0x1]   ;;  %v103_v1 = vld [vmem:[%s207_s0 + $0xd] sm:$0x1]   ;;  %v105_v2 = vld [vmem:[%s207_s0 + $0xb] sm:$0x1]  }
   0x2   :  { %7 = vrot.lane.b32.xlu0 %v101_v0, %s131_s10  ;;  %19 = vrot.lane.b32.xlu1 %v103_v1, %s132_s11  ;;  %s133_s14 = smov 88   ;;  %v102_v3 = vld [vmem:[%s207_s0 + $0xe] sm:$0x1]   ;;  %v104_v4 = vld [vmem:[%s207_s0 + $0xc] sm:$0x1]   ;;  %s134_s19 = smov 112  }
   0x3   :  { %31 = vrot.lane.b32.xlu2 %v105_v2, %s133_s14  ;;  %s135_s20 = smov 96   ;;  %v106_v5 = vld [vmem:[%s207_s0 + $0xa] sm:$0x1]   ;;  %s136_s23 = smov 80   ;;  %v107_v6 = vld [vmem:[%s207_s0 + $0x9] sm:$0x1]  }
   0x4   :  { %v108_v7 = vld [vmem:[%s207_s0 + $0x8] sm:$0x1]   ;;  %s137_s28 = smov 72   ;;  %s138_s29 = smov 64   ;;  %v109_v8 = vld [vmem:[%s207_s0 + $0x7] sm:$0x1]  }
   0x5   :  { %s139_s3 = smov 56   ;;  %v110_v9 = vld [vmem:[%s207_s0 + $0x6] sm:$0x1]   ;;  %v111_v10 = vld [vmem:[%s207_s0 + $0x5] sm:$0x1]   ;;  %s140_s8 = smov 48  }
   0x6   :  { %s141_s9 = smov 40   ;;  %v112_v11 = vld [vmem:[%s207_s0 + $0x4] sm:$0x1]   ;;  %s142_s12 = smov 32   ;;  %v113_v12 = vld [vmem:[%s207_s0 + $0x3] sm:$0x1]  }
   0x7   :  { %v114_v13 = vld [vmem:[%s207_s0 + $0x2] sm:$0x1]   ;;  %s143_s17 = smov 24   ;;  %s144_s18 = smov 16   ;;  %v115_v14 = vld [vmem:[%s207_s0 + $0x1] sm:$0x1]  }
   0x8   :  { %s145_s21 = smov 8   ;;  %v2_v15 = vld [vmem:[%s207_s0] sm:$0x1]   ;;  %vm27_vm4 = vcmask 851712   ;;  %vm33_vm5 = vcmask 786112   ;;  %vm39_vm6 = vcmask 720512  }
   0x9   :  { %4 = vst.msk [vmem:[#allocation0] sm:$0x1] %vm3_vm0, %v2_v15   ;;  %vm45_vm7 = vcmask 654912   ;;  %vm51_vm8 = vcmask 589312   ;;  %vm57_vm9 = vcmask 523712   ;;  %vm63_vm10 = vcmask 458112  }
   0xa   :  { %13 = vrot.lane.b32.xlu0 %v102_v3, %s134_s19  ;;  %25 = vrot.lane.b32.xlu1 %v104_v4, %s135_s20  ;;  %vm69_vm11 = vcmask 392512   ;;  %vm75_vm12 = vcmask 326912   ;;  %vm81_vm13 = vcmask 261312   ;;  %vm87_vm14 = vcmask 195712  }
   0xb   :  { %37 = vrot.lane.b32.xlu2 %v106_v5, %s136_s23  ;;  %vm93_vm15 = vcmask 130112  }
  0x12   :  { %43 = vrot.lane.b32.xlu0 %v107_v6, %s137_s28  ;;  %49 = vrot.lane.b32.xlu1 %v108_v7, %s138_s29 }
  0x13   :  { %55 = vrot.lane.b32.xlu2 %v109_v8, %s139_s3 }
  0x1a   :  { %61 = vrot.lane.b32.xlu0 %v110_v9, %s140_s8  ;;  %67 = vrot.lane.b32.xlu1 %v111_v10, %s141_s9 }
  0x1b   :  { %73 = vrot.lane.b32.xlu2 %v112_v11, %s142_s12 }
  0x22   :  { %79 = vrot.lane.b32.xlu0 %v113_v12, %s143_s17  ;;  %85 = vrot.lane.b32.xlu1 %v114_v13, %s144_s18 }
  0x23   :  { %91 = vrot.lane.b32.xlu2 %v115_v14, %s145_s21 }
  0x5d   :  { %v32_v16 = vpop.permute.xlu2 %31  }
  0x65   :  { %v38_v17 = vpop.permute.xlu2 %37  }
  0x6d   :  { %v56_v18 = vpop.permute.xlu2 %55  }
  0x74   :  { %v8_v19 = vpop.permute.xlu0 %7   ;;  %v20_v20 = vpop.permute.xlu1 %19  }
  0x75   :  { %10 = vst.msk [vmem:[#allocation0] sm:$0x1] %vm9_vm1, %v8_v19   ;;  %v74_v21 = vpop.permute.xlu2 %73  }
  0x7c   :  { %v14_v22 = vpop.permute.xlu0 %13   ;;  %v26_v23 = vpop.permute.xlu1 %25  }
  0x7d   :  { %16 = vst.msk [vmem:[#allocation0] sm:$0x1] %vm15_vm2, %v14_v22   ;;  %v92_v24 = vpop.permute.xlu2 %91  }
  0x7e   :  { %22 = vst.msk [vmem:[#allocation0] sm:$0x1] %vm21_vm3, %v20_v20  }
  0x7f   :  { %28 = vst.msk [vmem:[#allocation0] sm:$0x1] %vm27_vm4, %v26_v23  }
  0x80   :  { %34 = vst.msk [vmem:[#allocation0] sm:$0x1] %vm33_vm5, %v32_v16  }
  0x81   :  { %40 = vst.msk [vmem:[#allocation0] sm:$0x1] %vm39_vm6, %v38_v17  }
  0x84   :  { %v44_v25 = vpop.permute.xlu0 %43   ;;  %v50_v26 = vpop.permute.xlu1 %49  }
  0x85   :  { %46 = vst.msk [vmem:[#allocation0] sm:$0x1] %vm45_vm7, %v44_v25  }
  0x86   :  { %52 = vst.msk [vmem:[#allocation0] sm:$0x1] %vm51_vm8, %v50_v26  }
  0x87   :  { %58 = vst.msk [vmem:[#allocation0] sm:$0x1] %vm57_vm9, %v56_v18  }
  0x8c   :  { %v62_v27 = vpop.permute.xlu0 %61   ;;  %v68_v28 = vpop.permute.xlu1 %67  }
  0x8d   :  { %64 = vst.msk [vmem:[#allocation0] sm:$0x1] %vm63_vm10, %v62_v27  }
  0x8e   :  { %70 = vst.msk [vmem:[#allocation0] sm:$0x1] %vm69_vm11, %v68_v28  }
  0x8f   :  { %76 = vst.msk [vmem:[#allocation0] sm:$0x1] %vm75_vm12, %v74_v21  }
  0x94   :  { %v80_v29 = vpop.permute.xlu0 %79   ;;  %v86_v30 = vpop.permute.xlu1 %85  }
  0x95   :  { %82 = vst.msk [vmem:[#allocation0] sm:$0x1] %vm81_vm13, %v80_v29  }
  0x96   :  { %88 = vst.msk [vmem:[#allocation0] sm:$0x1] %vm87_vm14, %v86_v30  }
  0x97   :  { %94 = vst.msk [vmem:[#allocation0] sm:$0x1] %vm93_vm15, %v92_v24  }
  0x9e   :  { %v97_v31 = vld [vmem:[#allocation0] sm:$0x1] }
  0x9f   :  { %100 = vst [vmem:[%s208_s1] sm:$0x1] %v97_v31 }

// kernel: conv_block.3
= control target key start
LH: loop header
LB: loop body
LE: loop exit
PB: predicated region body
PF: predicated region fallthrough
CT: control target
= control target key end

     0   :  { %s832_s12 = smov 0   ;;  %s834_s13 = smov 0   ;;  %s947_s0 = inlined_call_operand.vmem [shape: f32[2,16,128], index: 0, kind: input, shape index: {}]   ;;  %s948_s1 = inlined_call_operand.vmem [shape: bf16[384,128], index: 1, kind: input, shape index: {}]   ;;  %s949_s2 = inlined_call_operand.vmem [shape: bf16[2,16,128], index: 2, kind: output, shape index: {0}]   ;;  %s950_s3 = inlined_call_operand.vmem [shape: f32[2,1,2,128], index: 3, kind: output, shape index: {1}]  }
   0x1   :  { %s836_s14 = smov 0  }
   0x2 LB: > { %s26_s15 = sadd.s32 1, %s805_s13  ;;  %p620_p0 = scmp.ge.s32.totalorder %s809_s14, 1  ;;  %s809_s14 = sphi %s836_s14, %s14_s14   ;;  %s805_s13 = sphi %s834_s13, %s952_s13   ;;  %s801_s12 = sphi %s832_s12, %s951_s12  }
   0x3   : > { %p28_p1 = scmp.ge.s32.totalorder %s26_s15, 2  ;;  %p156_p2 = scmp.lt.s32.totalorder %s809_s14, 3 }
   0x5   : > { %s954_s15 = smov (%p28_p1, %s26_s15), 0  ;;  %p157_p3 = pnand %p620_p0, %p156_p2 }
   0x6   : > { %p191_p4 = scmp.lt.s32.totalorder (!%p157_p3), %s801_s12, 1 }
   0x7   : > { %160 = sbr.rel (%p157_p3) target bundleno = 205 (0xcd), region = 28 }
   0xc   : > { %v740_v0 = vld [vmem:[%s948_s1 + $0x38] sm:$0xff]  ;;  %v739_v3 = vld [vmem:[%s948_s1 + $0x30] sm:$0xff]  ;;  %v738_v6 = vld [vmem:[%s948_s1 + $0x28] sm:$0xff]  ;;  %s956_s12 = smov (!%p191_p4, %s801_s12), 1  ;;  %vm219_vm0 = vcmask 1040384   ;;  %vm226_vm1 = vcmask 1046528  }
   0xd   : > { %v748_v1 = vld [vmem:[%s948_s1 + $0x78] sm:$0xff]  ;;  %428 = vmatpush.bf16.msra.mxu0 %v740_v0  ;;  %v747_v4 = vld [vmem:[%s948_s1 + $0x70] sm:$0xff]  ;;  %v746_v7 = vld [vmem:[%s948_s1 + $0x68] sm:$0xff]  ;;  %s731_s17 = sshll.u32 %s956_s12, 4  ;;  %vm811_vm3 = vmmov 1   ;;  %s732_s22 = sshll.u32 %s956_s12, 3 }
   0xe   : > { %v756_v2 = vld [vmem:[%s948_s1 + $0xb8] sm:$0xff]  ;;  %442 = vmatpush.bf16.msra.mxu1 %v748_v1  ;;  %v755_v5 = vld [vmem:[%s948_s1 + $0xb0] sm:$0xff]  ;;  %v754_v8 = vld [vmem:[%s948_s1 + $0xa8] sm:$0xff]  ;;  %s195_s26 = scalar_lea.vmem %s947_s0, %s731_s17  ;;  %s204_s25 = scalar_lea.vmem %s949_s2, %s732_s22 }
   0xf   : > { %456 = vmatpush.bf16.msra.mxu2 %v756_v2  ;;  %v737_v9 = vld [vmem:[%s948_s1 + $0x20] sm:$0xff]  ;;  %v736_v12 = vld [vmem:[%s948_s1 + $0x18] sm:$0xff]  ;;  %v735_v15 = vld [vmem:[%s948_s1 + $0x10] sm:$0xff] }
  0x10   : > { %v745_v10 = vld [vmem:[%s948_s1 + $0x60] sm:$0xff]  ;;  %v744_v13 = vld [vmem:[%s948_s1 + $0x58] sm:$0xff]  ;;  %v743_v16 = vld [vmem:[%s948_s1 + $0x50] sm:$0xff] }
  0x11   : > { %429 = vmatpush.bf16.msra.mxu0 %v739_v3  ;;  %v753_v11 = vld [vmem:[%s948_s1 + $0xa0] sm:$0xff]  ;;  %v752_v14 = vld [vmem:[%s948_s1 + $0x98] sm:$0xff]  ;;  %v751_v17 = vld [vmem:[%s948_s1 + $0x90] sm:$0xff] }
  0x12   : > { %443 = vmatpush.bf16.msra.mxu1 %v747_v4  ;;  %v215_v18 = vld [vmem:[%s195_s26] sm:$0xff]  ;;  %v216_v19 = vld [vmem:[%s195_s26 + $0x8] sm:$0xff]  ;;  %vm722_vm2 = vmneg %vm219_vm0  ;;  %s625_s26 = sshll.u32 %s956_s12, 1 }
  0x13   : > { %457 = vmatpush.bf16.msra.mxu2 %v755_v5  ;;  %v734_v20 = vld [vmem:[%s948_s1 + $0x8] sm:$0xff]  ;;  %v220_v22 = vrot.slane %v215_v18, 7  ;;  %v221_v23 = vrot.slane %v216_v19, 7  ;;  %v227_v25 = vrot.slane %v215_v18, 1  ;;  %v228_v26 = vrot.slane %v216_v19, 1  ;;  %v733_v27 = vld [vmem:[%s948_s1] sm:$0xff]  ;;  %vm723_vm4 = vmpackc.low %vm811_vm3, %vm722_vm2  ;;  %s212_s29 = scalar_lea.vmem %s950_s3, %s625_s26 }
  0x14   : > { %v742_v21 = vld [vmem:[%s948_s1 + $0x48] sm:$0xff]  ;;  %v741_v28 = vld [vmem:[%s948_s1 + $0x40] sm:$0xff]  ;;  %v234_v33 = vpack.c.bf16 %v216_v19, %v215_v18  ;;  %vm726_vm5 = vmpackc.low %vm226_vm1, %vm811_vm3 }
  0x15   : > { %430 = vmatpush.bf16.msra.mxu0 %v738_v6  ;;  %v750_v24 = vld [vmem:[%s948_s1 + $0x88] sm:$0xff]  ;;  %v222_v29 = vsel %vm219_vm0, %v220_v22, %v221_v23  ;;  %v749_v30 = vld [vmem:[%s948_s1 + $0x80] sm:$0xff]  ;;  %v229_v31 = vsel %vm226_vm1, %v227_v25, %v228_v26 }
  0x16   : > { %444 = vmatpush.bf16.msra.mxu1 %v746_v7  ;;  %v724_v32 = vpack.c.bf16 %v222_v29, %v220_v22  ;;  %v727_v34 = vpack.c.bf16 %v228_v26, %v229_v31 }
  0x17   : > { %458 = vmatpush.bf16.msra.mxu2 %v754_v8 }
  0x19   : > { %431 = vmatpush.bf16.msra.mxu0 %v737_v9 }
  0x1a   : > { %445 = vmatpush.bf16.msra.mxu1 %v745_v10 }
  0x1b   : > { %459 = vmatpush.bf16.msra.mxu2 %v753_v11 }
  0x1d   : > { %432 = vmatpush.bf16.msra.mxu0 %v736_v12 }
  0x1e   : > { %446 = vmatpush.bf16.msra.mxu1 %v744_v13 }
  0x1f   : > { %460 = vmatpush.bf16.msra.mxu2 %v752_v14 }
  0x21   : > { %433 = vmatpush.bf16.msra.mxu0 %v735_v15 }
  0x22   : > { %447 = vmatpush.bf16.msra.mxu1 %v743_v16 }
  0x23   : > { %461 = vmatpush.bf16.msra.mxu2 %v751_v17 }
  0x25   : > { %434 = vmatpush.bf16.msra.mxu0 %v734_v20 }
  0x26   : > { %448 = vmatpush.bf16.msra.mxu1 %v742_v21 }
  0x27   : > { %462 = vmatpush.bf16.msra.mxu2 %v750_v24 }
  0x29   : > { %435 = vmatpush.bf16.msra.mxu0 %v733_v27 }
  0x2a   : > { %449 = vmatpush.bf16.msra.mxu1 %v741_v28 }
  0x2b   : > { %463 = vmatpush.bf16.msra.mxu2 %v749_v30 }
  0x2c   : > { %725 = vmatmul.msk.bf16.vlgmr.msra.gmra.mxu0 %vm723_vm4, %v724_v32 }
  0x2d   : > { %450 = vmatmul.bf16.vlgmr.msra.gmra.mxu1 %v234_v33 }
  0x2e   : > { %728 = vmatmul.msk.bf16.vlgmr.msra.gmra.mxu2 %vm726_vm5, %v727_v34 }
  0xa9   : > { %v437_v35 = vpop.f32.mrf.mxu0 }
  0xaa   : > { %v451_v36 = vpop.f32.mrf.mxu1 }
  0xab   : > { %v452_v38 = vadd.f32 %v451_v36, %v437_v35 }
  0xb1   : > { %v465_v37 = vpop.f32.mrf.mxu2  ;;  %v439_v39 = vpop.f32.mrf.mxu0 }
  0xb2   : > { %v453_v40 = vpop.f32.mrf.mxu1  ;;  %v466_v41 = vadd.f32 %v465_v37, %v452_v38 }
  0xb3   : > { %v454_v42 = vadd.f32 %v453_v40, %v439_v39 }
  0xb4   : > { %v482_v45 = vmul.f32 %v466_v41, %v466_v41 }
  0xb9   : > { %v467_v43 = vpop.f32.mrf.mxu2 }
  0xba   : > { %v468_v44 = vadd.f32 %v467_v43, %v454_v42 }
  0xbc   : > { %v760_v46 = vpack.c.bf16 %v468_v44, %v466_v41  ;;  %v474_v47 = vadd.f32 %v468_v44, %v466_v41  ;;  %v483_v48 = vmul.f32 %v468_v44, %v468_v44 }
  0xbe   : > { %761 = vst [vmem:[%s204_s25] sm:$0xff] %v760_v46   ;;  %v475_v49 = vrot.slane %v474_v47, 4  ;;  %v484_v50 = vadd.f32 %v483_v48, %v482_v45 }
  0xc0   : > { %v476_v51 = vadd.f32 %v475_v49, %v474_v47  ;;  %v485_v52 = vrot.slane %v484_v50, 4 }
  0xc2   : > { %v477_v53 = vrot.slane %v476_v51, 2  ;;  %v486_v54 = vadd.f32 %v485_v52, %v484_v50 }
  0xc4   : > { %v478_v55 = vadd.f32 %v477_v53, %v476_v51  ;;  %v487_v56 = vrot.slane %v486_v54, 2 }
  0xc6   : > { %v479_v57 = vrot.slane %v478_v55, 1  ;;  %v488_v58 = vadd.f32 %v487_v56, %v486_v54 }
  0xc8   : > { %v480_v59 = vadd.f32 %v479_v57, %v478_v55  ;;  %v489_v60 = vrot.slane %v488_v58, 1 }
  0xca   : > { %481 = vst [vmem:[%s212_s29] sm:$0x1] %v480_v59  ;;  %v490_v61 = vadd.f32 %v489_v60, %v488_v58 }
  0xcc   : > { %491 = vst [vmem:[%s212_s29 + $0x1] sm:$0x1] %v490_v61 }
  0xcd PF: > { %s14_s14 = sadd.s32 1, %s809_s14   ;;  %s951_s12 = smov %s805_s13 }
  0xce   : > { %p11_p5 = scmp.ge.s32.totalorder %s14_s14, 4   ;;  %s952_s13 = smov %s954_s15 }
  0xd0   :  { %13 = sbr.rel (!%p11_p5) target bundleno = 2 (0x2), region = 71 }

// kernel: conv_block.5
= control target key start
LH: loop header
LB: loop body
LE: loop exit
PB: predicated region body
PF: predicated region fallthrough
CT: control target
= control target key end

     0   :  { %s98_s0 = inlined_call_operand.vmem [shape: f32[32,128], index: 0, kind: input, shape index: {}]   ;;  %s99_s1 = inlined_call_operand.vmem [shape: f32[1,128], index: 1, kind: input, shape index: {}]   ;;  %s100_s2 = inlined_call_operand.vmem [shape: f32[1,128], index: 2, kind: input, shape index: {}]   ;;  %s101_s3 = inlined_call_operand.vmem [shape: f32[32,128], index: 3, kind: output, shape index: {}]  }
   0x1   :  { %v14_v0 = vld [vmem:[%s98_s0] sm:$0xff]  ;;  %v15_v3 = vld [vmem:[%s98_s0 + $0x8] sm:$0xff]  ;;  %v16_v6 = vld [vmem:[%s98_s0 + $0x10] sm:$0xff] }
   0x2   :  { %v46_v1 = vld [vmem:[%s99_s1] ss:$0 sm:$0xff]  ;;  %v17_v7 = vld [vmem:[%s98_s0 + $0x18] sm:$0xff] }
   0x3   :  { %v47_v2 = vld [vmem:[%s100_s2] ss:$0 sm:$0xff]  ;;  %v22_v4 = vmul.f32 %v46_v1, %v14_v0  ;;  %v23_v5 = vmul.f32 %v46_v1, %v15_v3  ;;  %v24_v8 = vmul.f32 %v46_v1, %v16_v6  ;;  %v25_v9 = vmul.f32 %v46_v1, %v17_v7 }
   0x5   :  { %v30_v10 = vadd.f32 %v47_v2, %v22_v4  ;;  %v31_v11 = vadd.f32 %v47_v2, %v23_v5  ;;  %v32_v12 = vadd.f32 %v47_v2, %v24_v8  ;;  %v33_v13 = vadd.f32 %v47_v2, %v25_v9 }
   0x7   :  { %v34_v14 = vmax.f32 %v30_v10, 0.0  ;;  %v35_v15 = vmax.f32 %v31_v11, 0.0  ;;  %v36_v16 = vmax.f32 %v32_v12, 0.0  ;;  %v37_v17 = vmax.f32 %v33_v13, 0.0 }
   0x9   :  { %38 = vst [vmem:[%s101_s3] sm:$0xff] %v34_v14 }
   0xa   :  { %39 = vst [vmem:[%s101_s3 + $0x8] sm:$0xff] %v35_v15 }
   0xb   :  { %40 = vst [vmem:[%s101_s3 + $0x10] sm:$0xff] %v36_v16 }
   0xc   :  { %41 = vst [vmem:[%s101_s3 + $0x18] sm:$0xff] %v37_v17 }

// kernel: conv_block.4
= control target key start
LH: loop header
LB: loop body
LE: loop exit
PB: predicated region body
PF: predicated region fallthrough
CT: control target
= control target key end

     0   :  { %s914_s18 = smov 0   ;;  %s916_s19 = smov 0   ;;  %s1035_s0 = inlined_call_operand.vmem [shape: bf16[2,16,128], index: 0, kind: input, shape index: {}]   ;;  %s1036_s1 = inlined_call_operand.vmem [shape: bf16[384,128], index: 1, kind: input, shape index: {}]   ;;  %s1037_s2 = inlined_call_operand.vmem [shape: f32[1,128], index: 2, kind: input, shape index: {}]   ;;  %s1038_s3 = inlined_call_operand.vmem [shape: f32[1,128], index: 3, kind: input, shape index: {}]   ;;  %s1039_s4 = inlined_call_operand.vmem [shape: f32[2,16,128], index: 4, kind: output, shape index: {0}]   ;;  %s1040_s5 = inlined_call_operand.vmem [shape: f32[2,1,2,128], index: 5, kind: output, shape index: {1}]  }
   0x1   :  { %s918_s20 = smov 0  }
   0x2 LB: > { %s28_s21 = sadd.s32 1, %s877_s19  ;;  %p691_p0 = scmp.ge.s32.totalorder %s881_s20, 1  ;;  %s881_s20 = sphi %s918_s20, %s16_s20   ;;  %s877_s19 = sphi %s916_s19, %s1042_s19   ;;  %s873_s18 = sphi %s914_s18, %s1041_s18  }
   0x3   : > { %p30_p1 = scmp.ge.s32.totalorder %s28_s21, 2  ;;  %p206_p2 = scmp.lt.s32.totalorder %s881_s20, 3 }
   0x5   : > { %s1044_s21 = smov (%p30_p1, %s28_s21), 0  ;;  %p207_p3 = pnand %p691_p0, %p206_p2 }
   0x6   : > { %p245_p4 = scmp.lt.s32.totalorder (!%p207_p3), %s873_s18, 1 }
   0x7   : > { %210 = sbr.rel (%p207_p3) target bundleno = 205 (0xcd), region = 36 }
   0xc   : > { %v811_v0 = vld [vmem:[%s1036_s1 + $0x38] sm:$0xff]  ;;  %v810_v3 = vld [vmem:[%s1036_s1 + $0x30] sm:$0xff]  ;;  %s1046_s18 = smov (!%p245_p4, %s873_s18), 1  ;;  %v809_v6 = vld [vmem:[%s1036_s1 + $0x28] sm:$0xff]  ;;  %vm292_vm0 = vcmask 1040384   ;;  %vm299_vm1 = vcmask 1046528  }
   0xd   : > { %v819_v1 = vld [vmem:[%s1036_s1 + $0x78] sm:$0xff]  ;;  %501 = vmatpush.bf16.msra.mxu0 %v811_v0  ;;  %v818_v4 = vld [vmem:[%s1036_s1 + $0x70] sm:$0xff]  ;;  %s802_s9 = sshll.u32 %s1046_s18, 3  ;;  %v817_v7 = vld [vmem:[%s1036_s1 + $0x68] sm:$0xff]  ;;  %vm883_vm3 = vmmov 1   ;;  %s803_s11 = sshll.u32 %s1046_s18, 4 }
   0xe   : > { %v827_v2 = vld [vmem:[%s1036_s1 + $0xb8] sm:$0xff]  ;;  %515 = vmatpush.bf16.msra.mxu1 %v819_v1  ;;  %v826_v5 = vld [vmem:[%s1036_s1 + $0xb0] sm:$0xff]  ;;  %s249_s12 = scalar_lea.vmem %s1035_s0, %s802_s9  ;;  %v825_v8 = vld [vmem:[%s1036_s1 + $0xa8] sm:$0xff]  ;;  %s258_s14 = scalar_lea.vmem %s1039_s4, %s803_s11 }
   0xf   : > { %529 = vmatpush.bf16.msra.mxu2 %v827_v2  ;;  %v829_v9 = vld [vmem:[%s249_s12] sm:$0xff]   ;;  %v807_v19 = vld [vmem:[%s1036_s1 + $0x18] sm:$0xff]  ;;  %v806_v24 = vld [vmem:[%s1036_s1 + $0x10] sm:$0xff]  ;;  %s696_s15 = sshll.u32 %s1046_s18, 1 }
  0x10   : > { %v857_v10 = vld [vmem:[%s1037_s2] ss:$0 sm:$0xff]  ;;  %v830_v11 = vunpack.c.l.bf16 %v829_v9  ;;  %v831_v12 = vunpack.c.h.bf16 %v829_v9  ;;  %v815_v20 = vld [vmem:[%s1036_s1 + $0x58] sm:$0xff]  ;;  %v814_v25 = vld [vmem:[%s1036_s1 + $0x50] sm:$0xff]  ;;  %s266_s22 = scalar_lea.vmem %s1040_s5, %s696_s15 }
  0x11   : > { %502 = vmatpush.bf16.msra.mxu0 %v810_v3  ;;  %v808_v13 = vld [vmem:[%s1036_s1 + $0x20] sm:$0xff]  ;;  %v823_v23 = vld [vmem:[%s1036_s1 + $0x98] sm:$0xff]  ;;  %v822_v28 = vld [vmem:[%s1036_s1 + $0x90] sm:$0xff] }
  0x12   : > { %516 = vmatpush.bf16.msra.mxu1 %v818_v4  ;;  %v816_v14 = vld [vmem:[%s1036_s1 + $0x60] sm:$0xff]  ;;  %v280_v17 = vmul.f32 %v857_v10, %v830_v11  ;;  %v281_v18 = vmul.f32 %v857_v10, %v831_v12  ;;  %v805_v29 = vld [vmem:[%s1036_s1 + $0x8] sm:$0xff]  ;;  %vm793_vm2 = vmneg %vm292_vm0 }
  0x13   : > { %530 = vmatpush.bf16.msra.mxu2 %v826_v5  ;;  %v858_v15 = vld [vmem:[%s1038_s3] ss:$0 sm:$0xff]  ;;  %v813_v30 = vld [vmem:[%s1036_s1 + $0x48] sm:$0xff]  ;;  %vm794_vm4 = vmpackc.low %vm883_vm3, %vm793_vm2 }
  0x14   : > { %v824_v16 = vld [vmem:[%s1036_s1 + $0xa0] sm:$0xff]  ;;  %v286_v21 = vadd.f32 %v858_v15, %v280_v17  ;;  %v287_v22 = vadd.f32 %v858_v15, %v281_v18  ;;  %v821_v33 = vld [vmem:[%s1036_s1 + $0x88] sm:$0xff]  ;;  %vm797_vm5 = vmpackc.low %vm299_vm1, %vm883_vm3 }
  0x15   : > { %503 = vmatpush.bf16.msra.mxu0 %v809_v6  ;;  %v804_v36 = vld [vmem:[%s1036_s1] sm:$0xff] }
  0x16   : > { %517 = vmatpush.bf16.msra.mxu1 %v817_v7  ;;  %v288_v26 = vmax.f32 %v286_v21, 0.0  ;;  %v289_v27 = vmax.f32 %v287_v22, 0.0  ;;  %v812_v37 = vld [vmem:[%s1036_s1 + $0x40] sm:$0xff] }
  0x17   : > { %531 = vmatpush.bf16.msra.mxu2 %v825_v8  ;;  %v820_v39 = vld [vmem:[%s1036_s1 + $0x80] sm:$0xff] }
  0x18   : > { %v293_v31 = vrot.slane %v288_v26, 7  ;;  %v294_v32 = vrot.slane %v289_v27, 7  ;;  %v300_v34 = vrot.slane %v288_v26, 1  ;;  %v301_v35 = vrot.slane %v289_v27, 1 }
  0x19   : > { %504 = vmatpush.bf16.msra.mxu0 %v808_v13  ;;  %v307_v42 = vpack.c.bf16 %v289_v27, %v288_v26 }
  0x1a   : > { %518 = vmatpush.bf16.msra.mxu1 %v816_v14  ;;  %v295_v38 = vsel %vm292_vm0, %v293_v31, %v294_v32  ;;  %v302_v40 = vsel %vm299_vm1, %v300_v34, %v301_v35 }
  0x1b   : > { %532 = vmatpush.bf16.msra.mxu2 %v824_v16  ;;  %v795_v41 = vpack.c.bf16 %v295_v38, %v293_v31  ;;  %v798_v43 = vpack.c.bf16 %v301_v35, %v302_v40 }
  0x1d   : > { %505 = vmatpush.bf16.msra.mxu0 %v807_v19 }
  0x1e   : > { %519 = vmatpush.bf16.msra.mxu1 %v815_v20 }
  0x1f   : > { %533 = vmatpush.bf16.msra.mxu2 %v823_v23 }
  0x21   : > { %506 = vmatpush.bf16.msra.mxu0 %v806_v24 }
  0x22   : > { %520 = vmatpush.bf16.msra.mxu1 %v814_v25 }
  0x23   : > { %534 = vmatpush.bf16.msra.mxu2 %v822_v28 }
  0x25   : > { %507 = vmatpush.bf16.msra.mxu0 %v805_v29 }
  0x26   : > { %521 = vmatpush.bf16.msra.mxu1 %v813_v30 }
  0x27   : > { %535 = vmatpush.bf16.msra.mxu2 %v821_v33 }
  0x29   : > { %508 = vmatpush.bf16.msra.mxu0 %v804_v36 }
  0x2a   : > { %522 = vmatpush.bf16.msra.mxu1 %v812_v37 }
  0x2b   : > { %536 = vmatpush.bf16.msra.mxu2 %v820_v39 }
  0x2c   : > { %796 = vmatmul.msk.bf16.vlgmr.msra.gmra.mxu0 %vm794_vm4, %v795_v41 }
  0x2d   : > { %523 = vmatmul.bf16.vlgmr.msra.gmra.mxu1 %v307_v42 }
  0x2e   : > { %799 = vmatmul.msk.bf16.vlgmr.msra.gmra.mxu2 %vm797_vm5, %v798_v43 }
  0xa9   : > { %v510_v44 = vpop.f32.mrf.mxu0 }
  0xaa   : > { %v524_v45 = vpop.f32.mrf.mxu1 }
  0xab   : > { %v525_v46 = vadd.f32 %v524_v45, %v510_v44 }
  0xb1   : > { %v538_v47 = vpop.f32.mrf.mxu2  ;;  %v512_v49 = vpop.f32.mrf.mxu0 }
  0xb2   : > { %v539_v48 = vadd.f32 %v538_v47, %v525_v46  ;;  %v526_v50 = vpop.f32.mrf.mxu1 }
  0xb3   : > { %v527_v51 = vadd.f32 %v526_v50, %v512_v49 }
  0xb4   : > { %543 = vst [vmem:[%s258_s14] sm:$0xff] %v539_v48  ;;  %v553_v54 = vmul.f32 %v539_v48, %v539_v48 }
  0xb9   : > { %v540_v52 = vpop.f32.mrf.mxu2 }
  0xba   : > { %v541_v53 = vadd.f32 %v540_v52, %v527_v51 }
  0xbc   : > { %544 = vst [vmem:[%s258_s14 + $0x8] sm:$0xff] %v541_v53  ;;  %v545_v55 = vadd.f32 %v541_v53, %v539_v48  ;;  %v554_v56 = vmul.f32 %v541_v53, %v541_v53 }
  0xbe   : > { %v546_v57 = vrot.slane %v545_v55, 4  ;;  %v555_v58 = vadd.f32 %v554_v56, %v553_v54 }
  0xc0   : > { %v547_v59 = vadd.f32 %v546_v57, %v545_v55  ;;  %v556_v60 = vrot.slane %v555_v58, 4 }
  0xc2   : > { %v548_v61 = vrot.slane %v547_v59, 2  ;;  %v557_v62 = vadd.f32 %v556_v60, %v555_v58 }
  0xc4   : > { %v549_v63 = vadd.f32 %v548_v61, %v547_v59  ;;  %v558_v0 = vrot.slane %v557_v62, 2 }
  0xc6   : > { %v550_v1 = vrot.slane %v549_v63, 1  ;;  %v559_v2 = vadd.f32 %v558_v0, %v557_v62 }
  0xc8   : > { %v551_v3 = vadd.f32 %v550_v1, %v549_v63  ;;  %v560_v4 = vrot.slane %v559_v2, 1 }
  0xca   : > { %552 = vst [vmem:[%s266_s22] sm:$0x1] %v551_v3  ;;  %v561_v5 = vadd.f32 %v560_v4, %v559_v2 }
  0xcc   : > { %562 = vst [vmem:[%s266_s22 + $0x1] sm:$0x1] %v561_v5 }
  0xcd PF: > { %s16_s20 = sadd.s32 1, %s881_s20   ;;  %s1041_s18 = smov %s877_s19 }
  0xce   : > { %p13_p5 = scmp.ge.s32.totalorder %s16_s20, 4   ;;  %s1042_s19 = smov %s1044_s21 }
  0xd0   :  { %15 = sbr.rel (!%p13_p5) target bundleno = 2 (0x2), region = 79 }

</bundles_post_ra>
